<compile_context>
chip_gen: v6e
topology: v6e:2x2x1
jax: 0.10.0
libtpu: 0.0.40
codegen_flags: <defaults>
</compile_context>

<pallas_src>
import functools
import math

import jax
import jax.numpy as jnp
import numpy as np
from jax.experimental import pallas as pl
from jax.experimental.pallas import tpu as pltpu


# ----------------------------------------------------------------------------
# Kernel: LN1 -> fused-QKV -> per-head attention -> out-proj -> residual
#         -> LN2 -> MLP(QuickGELU) -> residual
# ----------------------------------------------------------------------------
def _block_kernel(
    x_ref, mask_ref,
    ln1_g_ref, ln1_b_ref,
    wqkv_ref, bqkv_ref, wo_ref, bo_ref,
    ln2_g_ref, ln2_b_ref,
    wfc_ref, bfc_ref, wproj_ref, bproj_ref,
    o_ref,
    qkv_scr, attn_scr,
    *, d_model: int, n_head: int, nb: int, seq_len: int,
):
    D, H, L = d_model, n_head, seq_len
    hd = D // H
    cdt = wqkv_ref.dtype          # MXU input dtype (bf16 on v6e/v7x; f32 optional)

    # Fold the Nb batch elements of this block into the matmul M dimension.
    x = x_ref[...].reshape(nb * L, D)          # f32
    mask = mask_ref[...]                        # (1 or nb, L, L) additive f32

    def layernorm(v, g_ref, b_ref):             # stats kept in f32
        mu = jnp.mean(v, axis=-1, keepdims=True)
        var = jnp.mean((v - mu) ** 2, axis=-1, keepdims=True)
        return (v - mu) * jax.lax.rsqrt(var + 1e-5) * g_ref[...] + b_ref[...]

    # ---- ln_1 + fused QKV projection (1/sqrt(hd) pre-folded into W_q, b_q) ----
    h = layernorm(x, ln1_g_ref, ln1_b_ref)
    qkv = jnp.dot(h.astype(cdt), wqkv_ref[...],
                  preferred_element_type=jnp.float32) + bqkv_ref[...]
    qkv_scr[...] = qkv.astype(cdt)              # stage in VMEM for per-head ref slices

    # ---- attention: per head, batched over the nb sequences of this block ----
    for head in range(H):
        lo = head * hd
        q = qkv_scr[:, lo:lo + hd].reshape(nb, L, hd)
        k = qkv_scr[:, D + lo:D + lo + hd].reshape(nb, L, hd)
        v = qkv_scr[:, 2 * D + lo:2 * D + lo + hd].reshape(nb, L, hd)

        s = jnp.einsum("nld,nmd->nlm", q, k,
                       preferred_element_type=jnp.float32) + mask   # (nb, L, L)
        s = s - jnp.max(s, axis=-1, keepdims=True)
        p = jnp.exp(s)
        p = p * pl.reciprocal(jnp.sum(p, axis=-1, keepdims=True), approx=True)

        o = jnp.einsum("nlm,nmd->nld", p.astype(cdt), v,
                       preferred_element_type=jnp.float32)          # (nb, L, hd)
        attn_scr[:, lo:lo + hd] = o.reshape(nb * L, hd).astype(cdt)

    # ---- output projection (one wide matmul over all heads) + residual ----
    attn = jnp.dot(attn_scr[...], wo_ref[...],
                   preferred_element_type=jnp.float32) + bo_ref[...]
    y1 = x + attn

    # ---- ln_2 + MLP (Linear -> QuickGELU -> Linear) + residual ----
    h2 = layernorm(y1, ln2_g_ref, ln2_b_ref)
    f = jnp.dot(h2.astype(cdt), wfc_ref[...],
                preferred_element_type=jnp.float32) + bfc_ref[...]
    f = f * jax.nn.sigmoid(1.702 * f)           # QuickGELU (f32)
    m = jnp.dot(f.astype(cdt), wproj_ref[...],
                preferred_element_type=jnp.float32) + bproj_ref[...]

    o_ref[...] = (y1 + m).reshape(nb, L, D).astype(o_ref.dtype)


# ----------------------------------------------------------------------------
# Wrapper
# ----------------------------------------------------------------------------
def _pick_block_batch(n, max_nb):
    nb = max(1, min(max_nb, n))
    while n % nb != 0:
        nb -= 1
    return nb


def residual_attention_block(x, attn_mask, params, n_head, *,
                             compute_dtype=jnp.bfloat16, max_block_batch=8):
    """x: (L, N, D) float32.
    attn_mask: additive float mask, (N, L, L) per-batch, or (L, L)/(1, L, L)
    shared across the batch (broadcast over heads, as in the PyTorch module)."""
    L, N, D = x.shape
    hd = D // n_head
    xb = jnp.transpose(x, (1, 0, 2))                     # (N, L, D)

    if attn_mask.ndim == 2:
        mask = attn_mask.reshape(1, L, L)
    else:
        mask = attn_mask
    shared_mask = mask.shape[0] == 1
    mask = mask.astype(jnp.float32)

    nb = _pick_block_batch(N, max_block_batch)
    grid = (N // nb,)

    cdt = compute_dtype
    scale = 1.0 / math.sqrt(hd)

    # Pre-transpose weights once (no in-kernel .T) and fold the head scale into
    # the Q columns / Q bias so the kernel never rescales activations.
    wqkv_t = jnp.transpose(params["wqkv"]).at[:, :D].multiply(scale).astype(cdt)
    bqkv = params["bqkv"].at[:D].multiply(scale)
    wo_t = jnp.transpose(params["wo"]).astype(cdt)
    wfc_t = jnp.transpose(params["wfc"]).astype(cdt)
    wproj_t = jnp.transpose(params["wproj"]).astype(cdt)

    def row(v):  # 1-D params -> (1, n), kept in f32
        return v.astype(jnp.float32).reshape(1, -1)

    param_args = [
        row(params["ln1_g"]), row(params["ln1_b"]),
        wqkv_t, row(bqkv), wo_t, row(params["bo"]),
        row(params["ln2_g"]), row(params["ln2_b"]),
        wfc_t, row(params["bfc"]), wproj_t, row(params["bproj"]),
    ]
    # Weights/biases are identical for every grid step -> constant index maps.
    param_specs = [pl.BlockSpec(p.shape, lambda b: (0, 0)) for p in param_args]

    if shared_mask:
        mask_spec = pl.BlockSpec((1, L, L), lambda b: (0, 0, 0))   # fetched once
    else:
        mask_spec = pl.BlockSpec((nb, L, L), lambda b: (b, 0, 0))

    kernel = functools.partial(_block_kernel, d_model=D, n_head=n_head,
                               nb=nb, seq_len=L)

    out = pl.pallas_call(
        kernel,
        out_shape=jax.ShapeDtypeStruct((N, L, D), x.dtype),
        grid=grid,
        in_specs=[
            pl.BlockSpec((nb, L, D), lambda b: (b, 0, 0)),
            mask_spec,
        ] + param_specs,
        out_specs=pl.BlockSpec((nb, L, D), lambda b: (b, 0, 0)),
        scratch_shapes=[
            pltpu.VMEM((nb * L, 3 * D), cdt),   # staged qkv (per-head ref slices)
            pltpu.VMEM((nb * L, D), cdt),       # head outputs -> one wide out-proj
        ],
        compiler_params=pltpu.CompilerParams(
            dimension_semantics=("parallel",),          # megacore / v7x dual-TC
            vmem_limit_bytes=48 * 1024 * 1024,          # <= v7x 64 MiB physical
        ),
    )(xb, mask, *param_args)

    return jnp.transpose(out, (1, 0, 2))                 # back to (L, N, D)


# ----------------------------------------------------------------------------
# Pure-JAX reference (mirrors PyTorch semantics) for correctness checks.
# ----------------------------------------------------------------------------
def reference_block(x, attn_mask, params, n_head):
    L, N, D = x.shape
    hd = D // n_head

    def ln(v, g, b):
        mu = jnp.mean(v, axis=-1, keepdims=True)
        var = jnp.mean((v - mu) ** 2, axis=-1, keepdims=True)
        return (v - mu) / jnp.sqrt(var + 1e-5) * g + b

    h = ln(x, params["ln1_g"], params["ln1_b"])           # (L, N, D)
    qkv = jnp.einsum("lnd,ed->lne", h, params["wqkv"]) + params["bqkv"]
    q, k, v = jnp.split(qkv, 3, axis=-1)

    def heads(t):  # (L, N, D) -> (N, H, L, hd)
        return jnp.transpose(t.reshape(L, N, n_head, hd), (1, 2, 0, 3))

    qh, kh, vh = heads(q), heads(k), heads(v)
    s = jnp.einsum("nhld,nhmd->nhlm", qh, kh) / math.sqrt(hd)
    s = s + attn_mask[:, None, :, :]
    p = jax.nn.softmax(s, axis=-1)
    o = jnp.einsum("nhlm,nhmd->nhld", p, vh)               # (N, H, L, hd)
    o = jnp.transpose(o, (2, 0, 1, 3)).reshape(L, N, D)
    o = jnp.einsum("lnd,ed->lne", o, params["wo"]) + params["bo"]

    y1 = x + o
    h2 = ln(y1, params["ln2_g"], params["ln2_b"])
    f = jnp.einsum("lnd,ed->lne", h2, params["wfc"]) + params["bfc"]
    f = f * jax.nn.sigmoid(1.702 * f)
    m = jnp.einsum("lnf,df->lnd", f, params["wproj"]) + params["bproj"]
    return y1 + m


# ----------------------------------------------------------------------------
if __name__ == "__main__":
    SEQ, BATCH, D_MODEL, N_HEAD = 8, 2, 32, 4
    FF = 4 * D_MODEL

    key = jax.random.PRNGKey(0)
    keys = jax.random.split(key, 12)

    params = {
        "ln1_g": jnp.ones((D_MODEL,), jnp.float32),
        "ln1_b": jnp.zeros((D_MODEL,), jnp.float32),
        "wqkv": 0.05 * jax.random.normal(keys[0], (3 * D_MODEL, D_MODEL), jnp.float32),
        "bqkv": 0.05 * jax.random.normal(keys[1], (3 * D_MODEL,), jnp.float32),
        "wo": 0.05 * jax.random.normal(keys[2], (D_MODEL, D_MODEL), jnp.float32),
        "bo": 0.05 * jax.random.normal(keys[3], (D_MODEL,), jnp.float32),
        "ln2_g": jnp.ones((D_MODEL,), jnp.float32),
        "ln2_b": jnp.zeros((D_MODEL,), jnp.float32),
        "wfc": 0.05 * jax.random.normal(keys[4], (FF, D_MODEL), jnp.float32),
        "bfc": 0.05 * jax.random.normal(keys[5], (FF,), jnp.float32),
        "wproj": 0.05 * jax.random.normal(keys[6], (D_MODEL, FF), jnp.float32),
        "bproj": 0.05 * jax.random.normal(keys[7], (D_MODEL,), jnp.float32),
    }

    x = jax.random.normal(keys[8], (SEQ, BATCH, D_MODEL), jnp.float32)
    # Additive causal mask (same convention as PyTorch float attn_mask).
    causal = jnp.where(
        jnp.tril(jnp.ones((SEQ, SEQ), jnp.float32)) > 0, 0.0, -1e9
    )
    attn_mask = jnp.broadcast_to(causal, (BATCH, SEQ, SEQ))

    ref = reference_block(x, attn_mask, params, N_HEAD)

    # 1) f32 MXU path, per-batch mask (general path).
    out_f32 = residual_attention_block(
        x, attn_mask, params, N_HEAD, compute_dtype=jnp.float32)
    out_f32 = jax.block_until_ready(out_f32)
    np.testing.assert_allclose(np.asarray(out_f32), np.asarray(ref),
                               rtol=1e-2, atol=1e-2)

    # 2) bf16 MXU inputs / f32 accumulation (v6e/v7x fast path), shared mask
    #    (skips the per-batch mask DMA entirely).
    out_bf16 = residual_attention_block(
        x, causal, params, N_HEAD, compute_dtype=jnp.bfloat16)
    out_bf16 = jax.block_until_ready(out_bf16)
    np.testing.assert_allclose(np.asarray(out_bf16), np.asarray(ref),
                               rtol=5e-2, atol=5e-2)

    print("KERNEL_OK")
</pallas_src>

<mosaic_0001>
module attributes {stable_mosaic.version = 11 : i64} {
  func.func @_block_kernel(%arg0: i32, %arg1: memref<2x8x32xf32, #tpu.memory_space<vmem>>, %arg2: memref<2x8x8xf32, #tpu.memory_space<vmem>>, %arg3: memref<1x32xf32, #tpu.memory_space<vmem>>, %arg4: memref<1x32xf32, #tpu.memory_space<vmem>>, %arg5: memref<32x96xf32, #tpu.memory_space<vmem>>, %arg6: memref<1x96xf32, #tpu.memory_space<vmem>>, %arg7: memref<32x32xf32, #tpu.memory_space<vmem>>, %arg8: memref<1x32xf32, #tpu.memory_space<vmem>>, %arg9: memref<1x32xf32, #tpu.memory_space<vmem>>, %arg10: memref<1x32xf32, #tpu.memory_space<vmem>>, %arg11: memref<32x128xf32, #tpu.memory_space<vmem>>, %arg12: memref<1x128xf32, #tpu.memory_space<vmem>>, %arg13: memref<128x32xf32, #tpu.memory_space<vmem>>, %arg14: memref<1x32xf32, #tpu.memory_space<vmem>>, %arg15: memref<2x8x32xf32, #tpu.memory_space<vmem>>, %arg16: memref<16x96xf32, #tpu.memory_space<vmem>>, %arg17: memref<16x32xf32, #tpu.memory_space<vmem>>) attributes {dimension_semantics = [#tpu.dimension_semantics<parallel>], iteration_bounds = array<i64: 1>, scalar_prefetch = 0 : i64, scratch_operands = 2 : i64, tpu.core_type = #tpu.core_type<tc>, window_params = [{transform_indices = @transform_0, window_bounds = array<i64: 2, 8, 32>}, {transform_indices = @transform_1, window_bounds = array<i64: 2, 8, 8>}, {pipeline_mode = #tpu.pipeline_mode<synchronous>, transform_indices = @transform_2, window_bounds = array<i64: 1, 32>}, {pipeline_mode = #tpu.pipeline_mode<synchronous>, transform_indices = @transform_3, window_bounds = array<i64: 1, 32>}, {pipeline_mode = #tpu.pipeline_mode<synchronous>, transform_indices = @transform_4, window_bounds = array<i64: 32, 96>}, {pipeline_mode = #tpu.pipeline_mode<synchronous>, transform_indices = @transform_5, window_bounds = array<i64: 1, 96>}, {pipeline_mode = #tpu.pipeline_mode<synchronous>, transform_indices = @transform_6, window_bounds = array<i64: 32, 32>}, {pipeline_mode = #tpu.pipeline_mode<synchronous>, transform_indices = @transform_7, window_bounds = array<i64: 1, 32>}, {pipeline_mode = #tpu.pipeline_mode<synchronous>, transform_indices = @transform_8, window_bounds = array<i64: 1, 32>}, {pipeline_mode = #tpu.pipeline_mode<synchronous>, transform_indices = @transform_9, window_bounds = array<i64: 1, 32>}, {pipeline_mode = #tpu.pipeline_mode<synchronous>, transform_indices = @transform_10, window_bounds = array<i64: 32, 128>}, {pipeline_mode = #tpu.pipeline_mode<synchronous>, transform_indices = @transform_11, window_bounds = array<i64: 1, 128>}, {pipeline_mode = #tpu.pipeline_mode<synchronous>, transform_indices = @transform_12, window_bounds = array<i64: 128, 32>}, {pipeline_mode = #tpu.pipeline_mode<synchronous>, transform_indices = @transform_13, window_bounds = array<i64: 1, 32>}, {transform_indices = @transform_14, window_bounds = array<i64: 2, 8, 32>}]} {
    %c0 = arith.constant 0 : index
    %c0_0 = arith.constant 0 : index
    %c0_1 = arith.constant 0 : index
    %0 = vector.load %arg1[%c0, %c0_0, %c0_1] : memref<2x8x32xf32, #tpu.memory_space<vmem>>, vector<2x8x32xf32>
    %1 = vector.shape_cast %0 : vector<2x8x32xf32> to vector<16x32xf32>
    %c0_2 = arith.constant 0 : index
    %c0_3 = arith.constant 0 : index
    %c0_4 = arith.constant 0 : index
    %2 = vector.load %arg2[%c0_2, %c0_3, %c0_4] : memref<2x8x8xf32, #tpu.memory_space<vmem>>, vector<2x8x8xf32>
    %cst = arith.constant dense<0.000000e+00> : vector<16xf32>
    %3 = vector.multi_reduction <add>, %1, %cst [1] : vector<16x32xf32> to vector<16xf32>
    %4 = vector.shape_cast %3 : vector<16xf32> to vector<16x1xf32>
    %cst_5 = arith.constant 3.200000e+01 : f32
    %5 = vector.broadcast %cst_5 : f32 to vector<16x1xf32>
    %6 = arith.divf %4, %5 : vector<16x1xf32>
    %7 = vector.broadcast %6 : vector<16x1xf32> to vector<16x32xf32>
    %8 = arith.subf %1, %7 : vector<16x32xf32>
    %9 = arith.mulf %8, %8 : vector<16x32xf32>
    %cst_6 = arith.constant dense<0.000000e+00> : vector<16xf32>
    %10 = vector.multi_reduction <add>, %9, %cst_6 [1] : vector<16x32xf32> to vector<16xf32>
    %11 = vector.shape_cast %10 : vector<16xf32> to vector<16x1xf32>
    %cst_7 = arith.constant 3.200000e+01 : f32
    %12 = vector.broadcast %cst_7 : f32 to vector<16x1xf32>
    %13 = arith.divf %11, %12 : vector<16x1xf32>
    %14 = vector.broadcast %6 : vector<16x1xf32> to vector<16x32xf32>
    %15 = arith.subf %1, %14 : vector<16x32xf32>
    %cst_8 = arith.constant 9.99999974E-6 : f32
    %16 = vector.broadcast %cst_8 : f32 to vector<16x1xf32>
    %17 = arith.addf %13, %16 : vector<16x1xf32>
    %18 = math.rsqrt %17 : vector<16x1xf32>
    %19 = vector.broadcast %18 : vector<16x1xf32> to vector<16x32xf32>
    %20 = arith.mulf %15, %19 : vector<16x32xf32>
    %c0_9 = arith.constant 0 : index
    %c0_10 = arith.constant 0 : index
    %21 = vector.load %arg3[%c0_9, %c0_10] : memref<1x32xf32, #tpu.memory_space<vmem>>, vector<1x32xf32>
    %22 = vector.broadcast %21 : vector<1x32xf32> to vector<16x32xf32>
    %23 = arith.mulf %20, %22 : vector<16x32xf32>
    %c0_11 = arith.constant 0 : index
    %c0_12 = arith.constant 0 : index
    %24 = vector.load %arg4[%c0_11, %c0_12] : memref<1x32xf32, #tpu.memory_space<vmem>>, vector<1x32xf32>
    %25 = vector.broadcast %24 : vector<1x32xf32> to vector<16x32xf32>
    %26 = arith.addf %23, %25 : vector<16x32xf32>
    %c0_13 = arith.constant 0 : index
    %c0_14 = arith.constant 0 : index
    %27 = vector.load %arg5[%c0_13, %c0_14] : memref<32x96xf32, #tpu.memory_space<vmem>>, vector<32x96xf32>
    %cst_15 = arith.constant dense<0.000000e+00> : vector<16x96xf32>
    %28 = tpu.matmul %26, %27, %cst_15 {dimension_numbers = #tpu.dot_dimension_numbers<[1], [0], [0], [1], [0, 0, 1, 1], [], []>} : vector<16x32xf32>, vector<32x96xf32>, vector<16x96xf32> -> vector<16x96xf32>
    %c0_16 = arith.constant 0 : index
    %c0_17 = arith.constant 0 : index
    %29 = vector.load %arg6[%c0_16, %c0_17] : memref<1x96xf32, #tpu.memory_space<vmem>>, vector<1x96xf32>
    %30 = vector.broadcast %29 : vector<1x96xf32> to vector<16x96xf32>
    %31 = arith.addf %28, %30 : vector<16x96xf32>
    %c0_18 = arith.constant 0 : index
    %c0_19 = arith.constant 0 : index
    %32 = vector.load %arg16[%c0_18, %c0_19] : memref<16x96xf32, #tpu.memory_space<vmem>>, vector<16x96xf32>
    tpu.vector_store %arg16[%c0_18, %c0_19], %31 {strides = array<i32>} : memref<16x96xf32, #tpu.memory_space<vmem>>, vector<16x96xf32>,
    %c0_20 = arith.constant 0 : index
    %c0_21 = arith.constant 0 : index
    %33 = vector.load %arg16[%c0_20, %c0_21] : memref<16x96xf32, #tpu.memory_space<vmem>>, vector<16x8xf32>
    %34 = vector.shape_cast %33 : vector<16x8xf32> to vector<2x8x8xf32>
    %c0_22 = arith.constant 0 : index
    %c32 = arith.constant 32 : index
    %35 = vector.load %arg16[%c0_22, %c32] : memref<16x96xf32, #tpu.memory_space<vmem>>, vector<16x8xf32>
    %36 = vector.shape_cast %35 : vector<16x8xf32> to vector<2x8x8xf32>
    %c0_23 = arith.constant 0 : index
    %c64 = arith.constant 64 : index
    %37 = vector.load %arg16[%c0_23, %c64] : memref<16x96xf32, #tpu.memory_space<vmem>>, vector<16x8xf32>
    %38 = vector.shape_cast %37 : vector<16x8xf32> to vector<2x8x8xf32>
    "tpu.trace_start"() <{level = 10 : i32, message = "nld,nmd->nlm"}> : () -> ()
    %cst_24 = arith.constant dense<0.000000e+00> : vector<2x8x8xf32>
    %39 = tpu.matmul %34, %36, %cst_24 {dimension_numbers = #tpu.dot_dimension_numbers<[2], [2], [1], [1], [0, 0, 0, 1, 1, 1], [0], [0]>} : vector<2x8x8xf32>, vector<2x8x8xf32>, vector<2x8x8xf32> -> vector<2x8x8xf32>
    "tpu.trace_stop"() : () -> ()
    %40 = arith.addf %39, %2 : vector<2x8x8xf32>
    %cst_25 = arith.constant dense<0xFF800000> : vector<2x8xf32>
    %41 = vector.multi_reduction <maximumf>, %40, %cst_25 [2] : vector<2x8x8xf32> to vector<2x8xf32>
    %42 = vector.shape_cast %41 : vector<2x8xf32> to vector<2x8x1xf32>
    %43 = vector.broadcast %42 : vector<2x8x1xf32> to vector<2x8x8xf32>
    %44 = arith.subf %40, %43 : vector<2x8x8xf32>
    %45 = math.exp %44 : vector<2x8x8xf32>
    %cst_26 = arith.constant dense<0.000000e+00> : vector<2x8xf32>
    %46 = vector.multi_reduction <add>, %45, %cst_26 [2] : vector<2x8x8xf32> to vector<2x8xf32>
    %47 = vector.shape_cast %46 : vector<2x8xf32> to vector<2x8x1xf32>
    %48 = tpu.reciprocal %47 {approx = true} : vector<2x8x1xf32> -> vector<2x8x1xf32>
    %49 = vector.broadcast %48 : vector<2x8x1xf32> to vector<2x8x8xf32>
    %50 = arith.mulf %45, %49 : vector<2x8x8xf32>
    "tpu.trace_start"() <{level = 10 : i32, message = "nlm,nmd->nld"}> : () -> ()
    %cst_27 = arith.constant dense<0.000000e+00> : vector<2x8x8xf32>
    %51 = tpu.matmul %50, %38, %cst_27 {dimension_numbers = #tpu.dot_dimension_numbers<[2], [1], [1], [2], [0, 0, 0, 1, 1, 2], [0], [0]>} : vector<2x8x8xf32>, vector<2x8x8xf32>, vector<2x8x8xf32> -> vector<2x8x8xf32>
    "tpu.trace_stop"() : () -> ()
    %52 = vector.shape_cast %51 : vector<2x8x8xf32> to vector<16x8xf32>
    %c0_28 = arith.constant 0 : index
    %c0_29 = arith.constant 0 : index
    %53 = vector.load %arg17[%c0_28, %c0_29] : memref<16x32xf32, #tpu.memory_space<vmem>>, vector<16x8xf32>
    tpu.vector_store %arg17[%c0_28, %c0_29], %52 {strides = array<i32>} : memref<16x32xf32, #tpu.memory_space<vmem>>, vector<16x8xf32>,
    %c0_30 = arith.constant 0 : index
    %c8 = arith.constant 8 : index
    %54 = vector.load %arg16[%c0_30, %c8] : memref<16x96xf32, #tpu.memory_space<vmem>>, vector<16x8xf32>
    %55 = vector.shape_cast %54 : vector<16x8xf32> to vector<2x8x8xf32>
    %c0_31 = arith.constant 0 : index
    %c40 = arith.constant 40 : index
    %56 = vector.load %arg16[%c0_31, %c40] : memref<16x96xf32, #tpu.memory_space<vmem>>, vector<16x8xf32>
    %57 = vector.shape_cast %56 : vector<16x8xf32> to vector<2x8x8xf32>
    %c0_32 = arith.constant 0 : index
    %c72 = arith.constant 72 : index
    %58 = vector.load %arg16[%c0_32, %c72] : memref<16x96xf32, #tpu.memory_space<vmem>>, vector<16x8xf32>
    %59 = vector.shape_cast %58 : vector<16x8xf32> to vector<2x8x8xf32>
    "tpu.trace_start"() <{level = 10 : i32, message = "nld,nmd->nlm"}> : () -> ()
    %cst_33 = arith.constant dense<0.000000e+00> : vector<2x8x8xf32>
    %60 = tpu.matmul %55, %57, %cst_33 {dimension_numbers = #tpu.dot_dimension_numbers<[2], [2], [1], [1], [0, 0, 0, 1, 1, 1], [0], [0]>} : vector<2x8x8xf32>, vector<2x8x8xf32>, vector<2x8x8xf32> -> vector<2x8x8xf32>
    "tpu.trace_stop"() : () -> ()
    %61 = arith.addf %60, %2 : vector<2x8x8xf32>
    %cst_34 = arith.constant dense<0xFF800000> : vector<2x8xf32>
    %62 = vector.multi_reduction <maximumf>, %61, %cst_34 [2] : vector<2x8x8xf32> to vector<2x8xf32>
    %63 = vector.shape_cast %62 : vector<2x8xf32> to vector<2x8x1xf32>
    %64 = vector.broadcast %63 : vector<2x8x1xf32> to vector<2x8x8xf32>
    %65 = arith.subf %61, %64 : vector<2x8x8xf32>
    %66 = math.exp %65 : vector<2x8x8xf32>
    %cst_35 = arith.constant dense<0.000000e+00> : vector<2x8xf32>
    %67 = vector.multi_reduction <add>, %66, %cst_35 [2] : vector<2x8x8xf32> to vector<2x8xf32>
    %68 = vector.shape_cast %67 : vector<2x8xf32> to vector<2x8x1xf32>
    %69 = tpu.reciprocal %68 {approx = true} : vector<2x8x1xf32> -> vector<2x8x1xf32>
    %70 = vector.broadcast %69 : vector<2x8x1xf32> to vector<2x8x8xf32>
    %71 = arith.mulf %66, %70 : vector<2x8x8xf32>
    "tpu.trace_start"() <{level = 10 : i32, message = "nlm,nmd->nld"}> : () -> ()
    %cst_36 = arith.constant dense<0.000000e+00> : vector<2x8x8xf32>
    %72 = tpu.matmul %71, %59, %cst_36 {dimension_numbers = #tpu.dot_dimension_numbers<[2], [1], [1], [2], [0, 0, 0, 1, 1, 2], [0], [0]>} : vector<2x8x8xf32>, vector<2x8x8xf32>, vector<2x8x8xf32> -> vector<2x8x8xf32>
    "tpu.trace_stop"() : () -> ()
    %73 = vector.shape_cast %72 : vector<2x8x8xf32> to vector<16x8xf32>
    %c0_37 = arith.constant 0 : index
    %c8_38 = arith.constant 8 : index
    %74 = vector.load %arg17[%c0_37, %c8_38] : memref<16x32xf32, #tpu.memory_space<vmem>>, vector<16x8xf32>
    tpu.vector_store %arg17[%c0_37, %c8_38], %73 {strides = array<i32>} : memref<16x32xf32, #tpu.memory_space<vmem>>, vector<16x8xf32>,
    %c0_39 = arith.constant 0 : index
    %c16 = arith.constant 16 : index
    %75 = vector.load %arg16[%c0_39, %c16] : memref<16x96xf32, #tpu.memory_space<vmem>>, vector<16x8xf32>
    %76 = vector.shape_cast %75 : vector<16x8xf32> to vector<2x8x8xf32>
    %c0_40 = arith.constant 0 : index
    %c48 = arith.constant 48 : index
    %77 = vector.load %arg16[%c0_40, %c48] : memref<16x96xf32, #tpu.memory_space<vmem>>, vector<16x8xf32>
    %78 = vector.shape_cast %77 : vector<16x8xf32> to vector<2x8x8xf32>
    %c0_41 = arith.constant 0 : index
    %c80 = arith.constant 80 : index
    %79 = vector.load %arg16[%c0_41, %c80] : memref<16x96xf32, #tpu.memory_space<vmem>>, vector<16x8xf32>
    %80 = vector.shape_cast %79 : vector<16x8xf32> to vector<2x8x8xf32>
    "tpu.trace_start"() <{level = 10 : i32, message = "nld,nmd->nlm"}> : () -> ()
    %cst_42 = arith.constant dense<0.000000e+00> : vector<2x8x8xf32>
    %81 = tpu.matmul %76, %78, %cst_42 {dimension_numbers = #tpu.dot_dimension_numbers<[2], [2], [1], [1], [0, 0, 0, 1, 1, 1], [0], [0]>} : vector<2x8x8xf32>, vector<2x8x8xf32>, vector<2x8x8xf32> -> vector<2x8x8xf32>
    "tpu.trace_stop"() : () -> ()
    %82 = arith.addf %81, %2 : vector<2x8x8xf32>
    %cst_43 = arith.constant dense<0xFF800000> : vector<2x8xf32>
    %83 = vector.multi_reduction <maximumf>, %82, %cst_43 [2] : vector<2x8x8xf32> to vector<2x8xf32>
    %84 = vector.shape_cast %83 : vector<2x8xf32> to vector<2x8x1xf32>
    %85 = vector.broadcast %84 : vector<2x8x1xf32> to vector<2x8x8xf32>
    %86 = arith.subf %82, %85 : vector<2x8x8xf32>
    %87 = math.exp %86 : vector<2x8x8xf32>
    %cst_44 = arith.constant dense<0.000000e+00> : vector<2x8xf32>
    %88 = vector.multi_reduction <add>, %87, %cst_44 [2] : vector<2x8x8xf32> to vector<2x8xf32>
    %89 = vector.shape_cast %88 : vector<2x8xf32> to vector<2x8x1xf32>
    %90 = tpu.reciprocal %89 {approx = true} : vector<2x8x1xf32> -> vector<2x8x1xf32>
    %91 = vector.broadcast %90 : vector<2x8x1xf32> to vector<2x8x8xf32>
    %92 = arith.mulf %87, %91 : vector<2x8x8xf32>
    "tpu.trace_start"() <{level = 10 : i32, message = "nlm,nmd->nld"}> : () -> ()
    %cst_45 = arith.constant dense<0.000000e+00> : vector<2x8x8xf32>
    %93 = tpu.matmul %92, %80, %cst_45 {dimension_numbers = #tpu.dot_dimension_numbers<[2], [1], [1], [2], [0, 0, 0, 1, 1, 2], [0], [0]>} : vector<2x8x8xf32>, vector<2x8x8xf32>, vector<2x8x8xf32> -> vector<2x8x8xf32>
    "tpu.trace_stop"() : () -> ()
    %94 = vector.shape_cast %93 : vector<2x8x8xf32> to vector<16x8xf32>
    %c0_46 = arith.constant 0 : index
    %c16_47 = arith.constant 16 : index
    %95 = vector.load %arg17[%c0_46, %c16_47] : memref<16x32xf32, #tpu.memory_space<vmem>>, vector<16x8xf32>
    tpu.vector_store %arg17[%c0_46, %c16_47], %94 {strides = array<i32>} : memref<16x32xf32, #tpu.memory_space<vmem>>, vector<16x8xf32>,
    %c0_48 = arith.constant 0 : index
    %c24 = arith.constant 24 : index
    %96 = vector.load %arg16[%c0_48, %c24] : memref<16x96xf32, #tpu.memory_space<vmem>>, vector<16x8xf32>
    %97 = vector.shape_cast %96 : vector<16x8xf32> to vector<2x8x8xf32>
    %c0_49 = arith.constant 0 : index
    %c56 = arith.constant 56 : index
    %98 = vector.load %arg16[%c0_49, %c56] : memref<16x96xf32, #tpu.memory_space<vmem>>, vector<16x8xf32>
    %99 = vector.shape_cast %98 : vector<16x8xf32> to vector<2x8x8xf32>
    %c0_50 = arith.constant 0 : index
    %c88 = arith.constant 88 : index
    %100 = vector.load %arg16[%c0_50, %c88] : memref<16x96xf32, #tpu.memory_space<vmem>>, vector<16x8xf32>
    %101 = vector.shape_cast %100 : vector<16x8xf32> to vector<2x8x8xf32>
    "tpu.trace_start"() <{level = 10 : i32, message = "nld,nmd->nlm"}> : () -> ()
    %cst_51 = arith.constant dense<0.000000e+00> : vector<2x8x8xf32>
    %102 = tpu.matmul %97, %99, %cst_51 {dimension_numbers = #tpu.dot_dimension_numbers<[2], [2], [1], [1], [0, 0, 0, 1, 1, 1], [0], [0]>} : vector<2x8x8xf32>, vector<2x8x8xf32>, vector<2x8x8xf32> -> vector<2x8x8xf32>
    "tpu.trace_stop"() : () -> ()
    %103 = arith.addf %102, %2 : vector<2x8x8xf32>
    %cst_52 = arith.constant dense<0xFF800000> : vector<2x8xf32>
    %104 = vector.multi_reduction <maximumf>, %103, %cst_52 [2] : vector<2x8x8xf32> to vector<2x8xf32>
    %105 = vector.shape_cast %104 : vector<2x8xf32> to vector<2x8x1xf32>
    %106 = vector.broadcast %105 : vector<2x8x1xf32> to vector<2x8x8xf32>
    %107 = arith.subf %103, %106 : vector<2x8x8xf32>
    %108 = math.exp %107 : vector<2x8x8xf32>
    %cst_53 = arith.constant dense<0.000000e+00> : vector<2x8xf32>
    %109 = vector.multi_reduction <add>, %108, %cst_53 [2] : vector<2x8x8xf32> to vector<2x8xf32>
    %110 = vector.shape_cast %109 : vector<2x8xf32> to vector<2x8x1xf32>
    %111 = tpu.reciprocal %110 {approx = true} : vector<2x8x1xf32> -> vector<2x8x1xf32>
    %112 = vector.broadcast %111 : vector<2x8x1xf32> to vector<2x8x8xf32>
    %113 = arith.mulf %108, %112 : vector<2x8x8xf32>
    "tpu.trace_start"() <{level = 10 : i32, message = "nlm,nmd->nld"}> : () -> ()
    %cst_54 = arith.constant dense<0.000000e+00> : vector<2x8x8xf32>
    %114 = tpu.matmul %113, %101, %cst_54 {dimension_numbers = #tpu.dot_dimension_numbers<[2], [1], [1], [2], [0, 0, 0, 1, 1, 2], [0], [0]>} : vector<2x8x8xf32>, vector<2x8x8xf32>, vector<2x8x8xf32> -> vector<2x8x8xf32>
    "tpu.trace_stop"() : () -> ()
    %115 = vector.shape_cast %114 : vector<2x8x8xf32> to vector<16x8xf32>
    %c0_55 = arith.constant 0 : index
    %c24_56 = arith.constant 24 : index
    %116 = vector.load %arg17[%c0_55, %c24_56] : memref<16x32xf32, #tpu.memory_space<vmem>>, vector<16x8xf32>
    tpu.vector_store %arg17[%c0_55, %c24_56], %115 {strides = array<i32>} : memref<16x32xf32, #tpu.memory_space<vmem>>, vector<16x8xf32>,
    %c0_57 = arith.constant 0 : index
    %c0_58 = arith.constant 0 : index
    %117 = vector.load %arg17[%c0_57, %c0_58] : memref<16x32xf32, #tpu.memory_space<vmem>>, vector<16x32xf32>
    %c0_59 = arith.constant 0 : index
    %c0_60 = arith.constant 0 : index
    %118 = vector.load %arg7[%c0_59, %c0_60] : memref<32x32xf32, #tpu.memory_space<vmem>>, vector<32x32xf32>
    %cst_61 = arith.constant dense<0.000000e+00> : vector<16x32xf32>
    %119 = tpu.matmul %117, %118, %cst_61 {dimension_numbers = #tpu.dot_dimension_numbers<[1], [0], [0], [1], [0, 0, 1, 1], [], []>} : vector<16x32xf32>, vector<32x32xf32>, vector<16x32xf32> -> vector<16x32xf32>
    %c0_62 = arith.constant 0 : index
    %c0_63 = arith.constant 0 : index
    %120 = vector.load %arg8[%c0_62, %c0_63] : memref<1x32xf32, #tpu.memory_space<vmem>>, vector<1x32xf32>
    %121 = vector.broadcast %120 : vector<1x32xf32> to vector<16x32xf32>
    %122 = arith.addf %119, %121 : vector<16x32xf32>
    %123 = arith.addf %1, %122 : vector<16x32xf32>
    %cst_64 = arith.constant dense<0.000000e+00> : vector<16xf32>
    %124 = vector.multi_reduction <add>, %123, %cst_64 [1] : vector<16x32xf32> to vector<16xf32>
    %125 = vector.shape_cast %124 : vector<16xf32> to vector<16x1xf32>
    %cst_65 = arith.constant 3.200000e+01 : f32
    %126 = vector.broadcast %cst_65 : f32 to vector<16x1xf32>
    %127 = arith.divf %125, %126 : vector<16x1xf32>
    %128 = vector.broadcast %127 : vector<16x1xf32> to vector<16x32xf32>
    %129 = arith.subf %123, %128 : vector<16x32xf32>
    %130 = arith.mulf %129, %129 : vector<16x32xf32>
    %cst_66 = arith.constant dense<0.000000e+00> : vector<16xf32>
    %131 = vector.multi_reduction <add>, %130, %cst_66 [1] : vector<16x32xf32> to vector<16xf32>
    %132 = vector.shape_cast %131 : vector<16xf32> to vector<16x1xf32>
    %cst_67 = arith.constant 3.200000e+01 : f32
    %133 = vector.broadcast %cst_67 : f32 to vector<16x1xf32>
    %134 = arith.divf %132, %133 : vector<16x1xf32>
    %135 = vector.broadcast %127 : vector<16x1xf32> to vector<16x32xf32>
    %136 = arith.subf %123, %135 : vector<16x32xf32>
    %cst_68 = arith.constant 9.99999974E-6 : f32
    %137 = vector.broadcast %cst_68 : f32 to vector<16x1xf32>
    %138 = arith.addf %134, %137 : vector<16x1xf32>
    %139 = math.rsqrt %138 : vector<16x1xf32>
    %140 = vector.broadcast %139 : vector<16x1xf32> to vector<16x32xf32>
    %141 = arith.mulf %136, %140 : vector<16x32xf32>
    %c0_69 = arith.constant 0 : index
    %c0_70 = arith.constant 0 : index
    %142 = vector.load %arg9[%c0_69, %c0_70] : memref<1x32xf32, #tpu.memory_space<vmem>>, vector<1x32xf32>
    %143 = vector.broadcast %142 : vector<1x32xf32> to vector<16x32xf32>
    %144 = arith.mulf %141, %143 : vector<16x32xf32>
    %c0_71 = arith.constant 0 : index
    %c0_72 = arith.constant 0 : index
    %145 = vector.load %arg10[%c0_71, %c0_72] : memref<1x32xf32, #tpu.memory_space<vmem>>, vector<1x32xf32>
    %146 = vector.broadcast %145 : vector<1x32xf32> to vector<16x32xf32>
    %147 = arith.addf %144, %146 : vector<16x32xf32>
    %c0_73 = arith.constant 0 : index
    %c0_74 = arith.constant 0 : index
    %148 = vector.load %arg11[%c0_73, %c0_74] : memref<32x128xf32, #tpu.memory_space<vmem>>, vector<32x128xf32>
    %cst_75 = arith.constant dense<0.000000e+00> : vector<16x128xf32>
    %149 = tpu.matmul %147, %148, %cst_75 {dimension_numbers = #tpu.dot_dimension_numbers<[1], [0], [0], [1], [0, 0, 1, 1], [], []>} : vector<16x32xf32>, vector<32x128xf32>, vector<16x128xf32> -> vector<16x128xf32>
    %c0_76 = arith.constant 0 : index
    %c0_77 = arith.constant 0 : index
    %150 = vector.load %arg12[%c0_76, %c0_77] : memref<1x128xf32, #tpu.memory_space<vmem>>, vector<1x128xf32>
    %151 = vector.broadcast %150 : vector<1x128xf32> to vector<16x128xf32>
    %152 = arith.addf %149, %151 : vector<16x128xf32>
    %cst_78 = arith.constant 1.702000e+00 : f32
    %153 = vector.broadcast %cst_78 : f32 to vector<16x128xf32>
    %154 = arith.mulf %153, %152 : vector<16x128xf32>
    %155 = arith.negf %154 : vector<16x128xf32>
    %156 = math.exp %155 : vector<16x128xf32>
    %cst_79 = arith.constant 1.000000e+00 : f32
    %157 = vector.broadcast %cst_79 : f32 to vector<16x128xf32>
    %158 = arith.addf %157, %156 : vector<16x128xf32>
    %159 = arith.divf %157, %158 : vector<16x128xf32>
    %160 = arith.mulf %152, %159 : vector<16x128xf32>
    %c0_80 = arith.constant 0 : index
    %c0_81 = arith.constant 0 : index
    %161 = vector.load %arg13[%c0_80, %c0_81] : memref<128x32xf32, #tpu.memory_space<vmem>>, vector<128x32xf32>
    %cst_82 = arith.constant dense<0.000000e+00> : vector<16x32xf32>
    %162 = tpu.matmul %160, %161, %cst_82 {dimension_numbers = #tpu.dot_dimension_numbers<[1], [0], [0], [1], [0, 0, 1, 1], [], []>} : vector<16x128xf32>, vector<128x32xf32>, vector<16x32xf32> -> vector<16x32xf32>
    %c0_83 = arith.constant 0 : index
    %c0_84 = arith.constant 0 : index
    %163 = vector.load %arg14[%c0_83, %c0_84] : memref<1x32xf32, #tpu.memory_space<vmem>>, vector<1x32xf32>
    %164 = vector.broadcast %163 : vector<1x32xf32> to vector<16x32xf32>
    %165 = arith.addf %162, %164 : vector<16x32xf32>
    %166 = arith.addf %123, %165 : vector<16x32xf32>
    %167 = vector.shape_cast %166 : vector<16x32xf32> to vector<2x8x32xf32>
    %c0_85 = arith.constant 0 : index
    %c0_86 = arith.constant 0 : index
    %c0_87 = arith.constant 0 : index
    %168 = vector.load %arg15[%c0_85, %c0_86, %c0_87] : memref<2x8x32xf32, #tpu.memory_space<vmem>>, vector<2x8x32xf32>
    tpu.vector_store %arg15[%c0_85, %c0_86, %c0_87], %167 {strides = array<i32>} : memref<2x8x32xf32, #tpu.memory_space<vmem>>, vector<2x8x32xf32>,
    return
  }
  func.func @transform_0(%arg0: i32) -> (i32, i32, i32) {
    %c0_i32 = arith.constant 0 : i32
    %c0_i32_0 = arith.constant 0 : i32
    %c0_i32_1 = arith.constant 0 : i32
    return %arg0, %c0_i32, %c0_i32_0 : i32, i32, i32
  }
  func.func @transform_1(%arg0: i32) -> (i32, i32, i32) {
    %c0_i32 = arith.constant 0 : i32
    %c0_i32_0 = arith.constant 0 : i32
    %c0_i32_1 = arith.constant 0 : i32
    return %arg0, %c0_i32, %c0_i32_0 : i32, i32, i32
  }
  func.func @transform_2(%arg0: i32) -> (i32, i32) {
    %c0_i32 = arith.constant 0 : i32
    %c0_i32_0 = arith.constant 0 : i32
    %c0_i32_1 = arith.constant 0 : i32
    return %c0_i32, %c0_i32_0 : i32, i32
  }
  func.func @transform_3(%arg0: i32) -> (i32, i32) {
    %c0_i32 = arith.constant 0 : i32
    %c0_i32_0 = arith.constant 0 : i32
    %c0_i32_1 = arith.constant 0 : i32
    return %c0_i32, %c0_i32_0 : i32, i32
  }
  func.func @transform_4(%arg0: i32) -> (i32, i32) {
    %c0_i32 = arith.constant 0 : i32
    %c0_i32_0 = arith.constant 0 : i32
    %c0_i32_1 = arith.constant 0 : i32
    return %c0_i32, %c0_i32_0 : i32, i32
  }
  func.func @transform_5(%arg0: i32) -> (i32, i32) {
    %c0_i32 = arith.constant 0 : i32
    %c0_i32_0 = arith.constant 0 : i32
    %c0_i32_1 = arith.constant 0 : i32
    return %c0_i32, %c0_i32_0 : i32, i32
  }
  func.func @transform_6(%arg0: i32) -> (i32, i32) {
    %c0_i32 = arith.constant 0 : i32
    %c0_i32_0 = arith.constant 0 : i32
    %c0_i32_1 = arith.constant 0 : i32
    return %c0_i32, %c0_i32_0 : i32, i32
  }
  func.func @transform_7(%arg0: i32) -> (i32, i32) {
    %c0_i32 = arith.constant 0 : i32
    %c0_i32_0 = arith.constant 0 : i32
    %c0_i32_1 = arith.constant 0 : i32
    return %c0_i32, %c0_i32_0 : i32, i32
  }
  func.func @transform_8(%arg0: i32) -> (i32, i32) {
    %c0_i32 = arith.constant 0 : i32
    %c0_i32_0 = arith.constant 0 : i32
    %c0_i32_1 = arith.constant 0 : i32
    return %c0_i32, %c0_i32_0 : i32, i32
  }
  func.func @transform_9(%arg0: i32) -> (i32, i32) {
    %c0_i32 = arith.constant 0 : i32
    %c0_i32_0 = arith.constant 0 : i32
    %c0_i32_1 = arith.constant 0 : i32
    return %c0_i32, %c0_i32_0 : i32, i32
  }
  func.func @transform_10(%arg0: i32) -> (i32, i32) {
    %c0_i32 = arith.constant 0 : i32
    %c0_i32_0 = arith.constant 0 : i32
    %c0_i32_1 = arith.constant 0 : i32
    return %c0_i32, %c0_i32_0 : i32, i32
  }
  func.func @transform_11(%arg0: i32) -> (i32, i32) {
    %c0_i32 = arith.constant 0 : i32
    %c0_i32_0 = arith.constant 0 : i32
    %c0_i32_1 = arith.constant 0 : i32
    return %c0_i32, %c0_i32_0 : i32, i32
  }
  func.func @transform_12(%arg0: i32) -> (i32, i32) {
    %c0_i32 = arith.constant 0 : i32
    %c0_i32_0 = arith.constant 0 : i32
    %c0_i32_1 = arith.constant 0 : i32
    return %c0_i32, %c0_i32_0 : i32, i32
  }
  func.func @transform_13(%arg0: i32) -> (i32, i32) {
    %c0_i32 = arith.constant 0 : i32
    %c0_i32_0 = arith.constant 0 : i32
    %c0_i32_1 = arith.constant 0 : i32
    return %c0_i32, %c0_i32_0 : i32, i32
  }
  func.func @transform_14(%arg0: i32) -> (i32, i32, i32) {
    %c0_i32 = arith.constant 0 : i32
    %c0_i32_0 = arith.constant 0 : i32
    %c0_i32_1 = arith.constant 0 : i32
    return %arg0, %c0_i32, %c0_i32_0 : i32, i32, i32
  }
}

</mosaic_0001>

<bundles_post_ra>
// kernel: tpu_custom_call.1
= control target key start
LH: loop header
LB: loop body
LE: loop exit
PB: predicated region body
PF: predicated region fallthrough
CT: control target
= control target key end

     0   :  { %vm52_vm0 = vcmask 261120   ;;  %s2666_s0 = inlined_call_operand.vmem [shape: f32[2,8,32], index: 0, kind: input, shape index: {}]   ;;  %s2667_s1 = inlined_call_operand.vmem [shape: f32[2,8,8], index: 1, kind: input, shape index: {}]   ;;  %s2668_s2 = inlined_call_operand.vmem [shape: f32[1,32], index: 2, kind: input, shape index: {}]   ;;  %s2669_s3 = inlined_call_operand.vmem [shape: f32[1,32], index: 3, kind: input, shape index: {}]   ;;  %s2670_s4 = inlined_call_operand.vmem [shape: f32[32,96], index: 4, kind: input, shape index: {}]   ;;  %s2671_s5 = inlined_call_operand.vmem [shape: f32[1,96], index: 5, kind: input, shape index: {}]   ;;  %s2672_s6 = inlined_call_operand.vmem [shape: f32[32,32], index: 6, kind: input, shape index: {}]   ;;  %s2673_s7 = inlined_call_operand.vmem [shape: f32[1,32], index: 7, kind: input, shape index: {}]   ;;  %s2674_s8 = inlined_call_operand.vmem [shape: f32[1,32], index: 8, kind: input, shape index: {}]   ;;  %s2675_s9 = inlined_call_operand.vmem [shape: f32[1,32], index: 9, kind: input, shape index: {}]   ;;  %s2676_s10 = inlined_call_operand.vmem [shape: f32[32,128], index: 10, kind: input, shape index: {}]   ;;  %s2677_s11 = inlined_call_operand.vmem [shape: f32[1,128], index: 11, kind: input, shape index: {}]   ;;  %s2678_s12 = inlined_call_operand.vmem [shape: f32[128,32], index: 12, kind: input, shape index: {}]   ;;  %s2679_s13 = inlined_call_operand.vmem [shape: f32[1,32], index: 13, kind: input, shape index: {}]   ;;  %s2680_s14 = inlined_call_operand.hbm [shape: f32[2,8,32], index: 14, kind: output, shape index: {}]  }
   0x1   :  { %v2367_v0 = vld [vmem:[%s2666_s0] sm:$0xff]  ;;  %v2372_v1 = vld [vmem:[%s2666_s0 + $0x8] sm:$0xff] }
   0x2   :  { %19 = vsyncpa [#allocation5], 0  ;;  %v53_v2 = vsel %vm52_vm0, %v2367_v0, 0.0  ;;  %v56_v3 = vsel %vm52_vm0, %v2372_v1, 0.0  ;;  %v101_v14 = vld [vmem:[%s2670_s4 + $0x18] sm:$0xff]  ;;  %v100_v15 = vld [vmem:[%s2670_s4 + $0x10] sm:$0xff] }
   0x3   :  { %54 = vadd.xlane.f32.xlu0 %v53_v2  ;;  %2035 = vmatprep.subr.mxu1 %v101_v14  ;;  %v99_v16 = vld [vmem:[%s2670_s4 + $0x8] sm:$0xff]  ;;  %v98_v17 = vld [vmem:[%s2670_s4] sm:$0xff]  ;;  %v2271_v35 = vmov 0.0   ;;  %vm190_vm1 = vcmask 785408   ;;  %vm2272_vm2 = vmmov 0   ;;  %vm198_vm3 = vcmask 64512  }
   0x4   :  { %2036 = vmatpush3.msra.mxu1 %v101_v14  ;;  %v1927_v25 = vld [vmem:[%s2668_s2] ss:$0 sm:$0xff]  ;;  %2056 = vmatprep.subr.mxu0 %v2271_v35  ;;  %s2273_s2 = smov 96   ;;  %v2438_v48 = vld [vmem:[%s2667_s1 + $0x8] sm:$0xff]  ;;  %s2274_s15 = smov 64   ;;  %vm868_vm4 = vcmask 130112  }
   0x5   :  { %2037 = vmatprep.subr.mxu1 %v100_v15  ;;  %v1928_v27 = vld [vmem:[%s2669_s3] ss:$0 sm:$0xff]  ;;  %2058 = vmatprep.mubr.msk.f32.mxu0 %vm2272_vm2, %v2271_v35  ;;  %s2275_s16 = smov 88   ;;  %s2277_s0 = smov 56   ;;  %vm1213_vm5 = vcmask 195712   ;;  %vm1558_vm6 = vcmask 261312  }
   0x6   :  { %2038 = vmatpush3.msra.mxu1 %v100_v15  ;;  %v1929_v34 = vld [vmem:[%s2671_s5] ss:$0 sm:$0xff]  ;;  %s2278_s17 = smov 80   ;;  %s2279_s18 = smov 112  }
   0x7   :  { %57 = vadd.xlane.f32.xlu0 %v56_v3  ;;  %2039 = vmatprep.subr.mxu1 %v99_v16  ;;  %v2432_v44 = vld [vmem:[%s2667_s1] sm:$0xff]  ;;  %s2276_s1 = smov 120   ;;  %s2280_s19 = smov 48  }
   0x8   :  { %2040 = vmatpush3.msra.mxu1 %v99_v16  ;;  %s2281_s20 = smov 72   ;;  %s2282_s21 = smov 104  }
   0x9   :  { %2041 = vmatprep.subr.mxu1 %v98_v17  ;;  %s2283_s22 = smov 40   ;;  %s2284_s23 = smov 8  }
   0xa   :  { %2042 = vmatpush3.msra.mxu1 %v98_v17  ;;  %s2285_s24 = smov 16   ;;  %s2286_s29 = smov 24  }
   0xb   :  { %2046 = vmatprep.subr.mxu1 %v2271_v35 }
  0x8c   :  { %v55_v4 = vpop.xlane.xlu0 %54 }
  0x8d   :  { %v60_v5 = vmul.f32 0.03125, %v55_v4 }
  0x8f   :  { %v62_v6 = vsub.f32 %v2367_v0, %v60_v5 }
  0x90   :  { %v58_v7 = vpop.xlane.xlu0 %57 }
  0x91   :  { %v61_v8 = vmul.f32 0.03125, %v58_v7  ;;  %v64_v9 = vmul.f32 %v62_v6, %v62_v6 }
  0x93   :  { %v63_v10 = vsub.f32 %v2372_v1, %v61_v8  ;;  %v66_v11 = vsel %vm52_vm0, %v64_v9, 0.0 }
  0x94   :  { %67 = vadd.xlane.f32.xlu1 %v66_v11 }
  0x95   :  { %v65_v12 = vmul.f32 %v63_v10, %v63_v10 }
  0x97   :  { %v69_v13 = vsel %vm52_vm0, %v65_v12, 0.0 }
  0x98   :  { %70 = vadd.xlane.f32.xlu1 %v69_v13 }
 0x11d   :  { %v68_v18 = vpop.xlane.xlu1 %67 }
 0x11e   :  { %v72_v19 = vmul.f32 0.03125, %v68_v18 }
 0x120   :  { %v74_v20 = vadd.f32 1e-05, %v72_v19 }
 0x121   :  { %v71_v21 = vpop.xlane.xlu1 %70 }
 0x122   :  { %2201 = vrsqrt.f32 %v74_v20  ;;  %v73_v22 = vmul.f32 0.03125, %v71_v21 }
 0x124   :  { %v75_v23 = vadd.f32 1e-05, %v73_v22 }
 0x126   :  { %2203 = vrsqrt.f32 %v75_v23 }
 0x12f   :  { %v2202_v24 = vpop.eup %2201 }
 0x130   :  { %v78_v26 = vmul.f32 %v2202_v24, %v62_v6 }
 0x132   :  { %v87_v28 = vmul.f32 %v1927_v25, %v78_v26 }
 0x133   :  { %v2204_v29 = vpop.eup %2203 }
 0x134   :  { %v79_v30 = vmul.f32 %v2204_v29, %v63_v10  ;;  %v96_v31 = vadd.f32 %v1928_v27, %v87_v28 }
 0x136   :  { %v88_v32 = vmul.f32 %v1927_v25, %v79_v30  ;;  %2043 = vmatprep.mubr.msk.f32.mxu1 %vm52_vm0, %v96_v31 }
 0x138   :  { %v97_v33 = vadd.f32 %v1928_v27, %v88_v32 }
 0x13a   :  { %2044 = vmatmul.mubr.msk.f32.vlgmr.msra.gmra.mxu1 %vm52_vm0, %v97_v33 }
 0x13b   :  { %2048 = vmatprep.mubr.msk.f32.mxu1 %vm2272_vm2, %v2271_v35 }
 0x1fa   :  { %v2045_v36 = vpop.f32.mrf.mxu1 }
 0x1fb   :  { %v187_v37 = vadd.f32 %v2045_v36, %v1929_v34 }
 0x1fc   :  { %v181_v38 = vpop.f32.mrf.mxu1 }
 0x1fd   :  { %192 = vst.msk [vmem:[#allocation2 + $0x8] sm:$0xff] %vm190_vm1, %v187_v37  ;;  %v182_v39 = vadd.f32 %v1929_v34, %v181_v38 }
 0x1ff   :  { %191 = vst.msk [vmem:[#allocation2] sm:$0xff] %vm190_vm1, %v182_v39 }
 0x204   :  { %v2411_v40 = vld [vmem:[#allocation2 + $0x8] sm:$0xff] }
 0x205   :  { %274 = vrot.lane.b32.xlu1 %v2411_v40, %s2273_s2 }
 0x206   :  { %v2414_v41 = vld [vmem:[#allocation2] sm:$0xff] }
 0x207   :  { %196 = vrot.lane.b32.xlu0 %v2414_v41, %s2273_s2  ;;  %s2287_s2 = smov [#allocation4]  }
 0x208   :  { %s1916_s3 = sshll.u32 %s2287_s2, 4  ;;  %s1917_s3 = int_to_ptr.vmem [resolvable:$true] %s1916_s3 }
 0x209   :  { %s2249_s5 = scalar_lea.vmem %s1917_s3, 256  ;;  %p2254_p1 = scmp.lt.s32.totalorder %s1917_s3, %s1917_s3 }
 0x20a   :  { %p2250_p0 = scmp.ne.s32.totalorder %s1917_s3, %s2249_s5  ;;  %p2255_p2 = scmp.lt.s32.totalorder %s2249_s5, %s2249_s5 }
 0x20c   :  { %p2256_p3 = por %p2255_p2, %p2254_p1 }
 0x20e   :  { %p2257_p4 = pnand %p2256_p3, %p2250_p0 }
 0x277   :  { %v275_v43 = vpop.permute.xlu1 %274 }
 0x279   :  { %v197_v42 = vpop.permute.xlu0 %196 }
 0x27a   :  { %2047 = vmatpush3.xpose.msk.msra.mxu1 %vm198_vm3, %v197_v42 }
 0x27b   :  { %2051 = vmatprep.subr.mxu1 %v2271_v35 }
 0x27d   :  { %2049 = vmatmul.mubr.msk.f32.vlgmr.msra.gmra.mxu1 %vm198_vm3, %v2414_v41 }
 0x27e   :  { %2052 = vmatpush3.xpose.msk.msra.mxu1 %vm198_vm3, %v275_v43  ;;  %2053 = vmatprep.mubr.msk.f32.mxu1 %vm2272_vm2, %v2271_v35 }
 0x27f   :  { %2061 = vmatprep.subr.mxu1 %v2271_v35 }
 0x281   :  { %2054 = vmatmul.mubr.msk.f32.vlgmr.msra.gmra.mxu1 %vm198_vm3, %v2411_v40 }
 0x282   :  { %2063 = vmatprep.mubr.msk.f32.mxu1 %vm2272_vm2, %v2271_v35 }
 0x33d   :  { %v269_v45 = vpop.f32.mrf.mxu1 }
 0x33e   :  { %v270_v46 = vadd.f32 %v269_v45, %v2432_v44 }
 0x33f   :  { %v2050_v47 = vpop.f32.mrf.mxu1 }
 0x340   :  { %v350_v49 = vsel %vm198_vm3, %v270_v46, -inf }
 0x341   :  { %351 = vmax.xlane.f32.xlu1 %v350_v49  ;;  %v346_v50 = vpop.f32.mrf.mxu1 }
 0x342   :  { %v347_v51 = vadd.f32 %v346_v50, %v2438_v48 }
 0x343   :  { %v2055_v52 = vpop.f32.mrf.mxu1 }
 0x344   :  { %v353_v53 = vsel %vm198_vm3, %v347_v51, -inf }
 0x345   :  { %354 = vmax.xlane.f32.xlu0 %v353_v53 }
 0x352   :  { %448 = vrot.lane.b32.xlu1 %v2411_v40, %s2274_s15 }
 0x356   :  { %531 = vrot.lane.b32.xlu1 %v2414_v41, %s2275_s16 }
 0x35a   :  { %610 = vrot.lane.b32.xlu1 %v2411_v40, %s2275_s16 }
 0x3ca   :  { %v352_v54 = vpop.xlane.xlu1 %351 }
 0x3cb   :  { %v356_v55 = vsub.f32 %v270_v46, %v352_v54 }
 0x3cd   :  { %v358_v56 = vmul.f32 1.442695, %v356_v55 }
 0x3ce   :  { %v449_v57 = vpop.permute.xlu1 %448  ;;  %v355_v58 = vpop.xlane.xlu0 %354 }
 0x3cf   :  { %2205 = vpow2.f32 %v358_v56  ;;  %v357_v59 = vsub.f32 %v347_v51, %v355_v58  ;;  %2062 = vmatpush3.msra.mxu1 %v449_v57 }
 0x3d0   :  { %2071 = vmatprep.subr.mxu1 %v2271_v35 }
 0x3d1   :  { %v360_v60 = vmul.f32 1.442695, %v357_v59 }
 0x3d2   :  { %v532_v3 = vpop.permute.xlu1 %531 }
 0x3d3   :  { %2207 = vpow2.f32 %v360_v60 }
 0x3d6   :  { %v611_v4 = vpop.permute.xlu1 %610 }
 0x3dc   :  { %v2206_v61 = vpop.eup %2205 }
 0x3dd   :  { %v362_v62 = vsel %vm198_vm3, %v2206_v61, 0.0 }
 0x3de   :  { %363 = vadd.xlane.f32.xlu0 %v362_v62 }
 0x3e0   :  { %v2208_v63 = vpop.eup %2207 }
 0x3e1   :  { %v365_v2 = vsel %vm198_vm3, %v2208_v63, 0.0 }
 0x3e2   :  { %366 = vadd.xlane.f32.xlu1 %v365_v2 }
 0x3f3   :  { %608 = vrot.lane.b32.xlu1 %v2411_v40, %s2276_s1 }
 0x3f4   :  { %372 = vrot.lane.b32.xlu0 %v2414_v41, %s2274_s15 }
 0x3f8   :  { %529 = vrot.lane.b32.xlu0 %v2414_v41, %s2276_s1 }
 0x467   :  { %v364_v5 = vpop.xlane.xlu0 %363 }
 0x468   :  { %2209 = vrcp.f32 %v364_v5 }
 0x46b   :  { %v367_v6 = vpop.xlane.xlu1 %366  ;;  %v373_v7 = vpop.permute.xlu0 %372 }
 0x46c   :  { %2211 = vrcp.f32 %v367_v6  ;;  %2057 = vmatpush3.msra.mxu0 %v373_v7 }
 0x46d   :  { %2066 = vmatprep.subr.mxu0 %v2271_v35 }
 0x46f   :  { %v530_v12 = vpop.permute.xlu0 %529  ;;  %v609_v13 = vpop.permute.xlu1 %608 }
 0x475   :  { %v2210_v8 = vpop.eup %2209 }
 0x476   :  { %v370_v9 = vmul.f32 %v2210_v8, %v2206_v61 }
 0x478   :  { %2059 = vmatmul.mubr.msk.f32.vlgmr.msra.gmra.mxu0 %vm198_vm3, %v370_v9 }
 0x479   :  { %v2212_v10 = vpop.eup %2211  ;;  %2067 = vmatpush3.xpose.msk.msra.mxu0 %vm198_vm3, %v532_v3  ;;  %2068 = vmatprep.mubr.msk.f32.mxu0 %vm2272_vm2, %v2271_v35 }
 0x47a   :  { %v371_v11 = vmul.f32 %v2212_v10, %v2208_v63  ;;  %2076 = vmatprep.subr.mxu0 %v2271_v35 }
 0x47c   :  { %2064 = vmatmul.mubr.msk.f32.vlgmr.msra.gmra.mxu1 %vm198_vm3, %v371_v11  ;;  %2069 = vmatmul.mubr.msk.f32.vlgmr.msra.gmra.mxu0 %vm198_vm3, %v530_v12 }
 0x47d   :  { %2072 = vmatpush3.xpose.msk.msra.mxu1 %vm198_vm3, %v611_v4  ;;  %2073 = vmatprep.mubr.msk.f32.mxu1 %vm2272_vm2, %v2271_v35 }
 0x47e   :  { %2081 = vmatprep.subr.mxu1 %v2271_v35  ;;  %2078 = vmatprep.mubr.msk.f32.mxu0 %vm2272_vm2, %v2271_v35 }
 0x480   :  { %2074 = vmatmul.mubr.msk.f32.vlgmr.msra.gmra.mxu1 %vm198_vm3, %v609_v13 }
 0x481   :  { %2083 = vmatprep.mubr.msk.f32.mxu1 %vm2272_vm2, %v2271_v35 }
 0x538   :  { %v444_v14 = vpop.f32.mrf.mxu0 }
 0x539   :  { %524 = vst.msk [vmem:[#allocation3] sm:$0xff] %vm198_vm3, %v444_v14 }
 0x53a   :  { %v2060_v15 = vpop.f32.mrf.mxu0 }
 0x53c   :  { %v520_v16 = vpop.f32.mrf.mxu1  ;;  %v603_v17 = vpop.f32.mrf.mxu0 }
 0x53d   :  { %525 = vst.msk [vmem:[#allocation3 + $0x8] sm:$0xff] %vm198_vm3, %v520_v16  ;;  %v604_v18 = vadd.f32 %v603_v17, %v2432_v44 }
 0x53e   :  { %v2065_v19 = vpop.f32.mrf.mxu1  ;;  %v2070_v20 = vpop.f32.mrf.mxu0 }
 0x53f   :  { %v686_v21 = vsel %vm198_vm3, %v604_v18, -inf }
 0x540   :  { %687 = vmax.xlane.f32.xlu0 %v686_v21  ;;  %v682_v22 = vpop.f32.mrf.mxu1 }
 0x541   :  { %v683_v23 = vadd.f32 %v682_v22, %v2438_v48 }
 0x542   :  { %v2075_v24 = vpop.f32.mrf.mxu1 }
 0x543   :  { %v689_v25 = vsel %vm198_vm3, %v683_v23, -inf }
 0x544   :  { %690 = vmax.xlane.f32.xlu1 %v689_v25 }
 0x555   :  { %784 = vrot.lane.b32.xlu1 %v2411_v40, %s2277_s0 }
 0x556   :  { %708 = vrot.lane.b32.xlu0 %v2414_v41, %s2277_s0 }
 0x559   :  { %876 = vrot.lane.b32.xlu1 %v2414_v41, %s2278_s17 }
 0x55d   :  { %955 = vrot.lane.b32.xlu1 %v2411_v40, %s2278_s17 }
 0x561   :  { %953 = vrot.lane.b32.xlu1 %v2411_v40, %s2279_s18 }
 0x5c9   :  { %v688_v26 = vpop.xlane.xlu0 %687 }
 0x5ca   :  { %v692_v27 = vsub.f32 %v604_v18, %v688_v26 }
 0x5cc   :  { %v694_v28 = vmul.f32 1.442695, %v692_v27 }
 0x5cd   :  { %v709_v29 = vpop.permute.xlu0 %708  ;;  %v691_v30 = vpop.xlane.xlu1 %690 }
 0x5ce   :  { %2213 = vpow2.f32 %v694_v28  ;;  %v693_v31 = vsub.f32 %v683_v23, %v691_v30  ;;  %2077 = vmatpush3.msra.mxu0 %v709_v29 }
 0x5cf   :  { %2086 = vmatprep.subr.mxu0 %v2271_v35 }
 0x5d0   :  { %v696_v32 = vmul.f32 1.442695, %v693_v31 }
 0x5d1   :  { %v785_v33 = vpop.permute.xlu1 %784 }
 0x5d2   :  { %2215 = vpow2.f32 %v696_v32  ;;  %2082 = vmatpush3.msra.mxu1 %v785_v33 }
 0x5d3   :  { %2091 = vmatprep.subr.mxu1 %v2271_v35 }
 0x5d5   :  { %v877_v43 = vpop.permute.xlu1 %876 }
 0x5d9   :  { %v956_v49 = vpop.permute.xlu1 %955 }
 0x5db   :  { %v2214_v34 = vpop.eup %2213 }
 0x5dc   :  { %v698_v36 = vsel %vm198_vm3, %v2214_v34, 0.0 }
 0x5dd   :  { %699 = vadd.xlane.f32.xlu0 %v698_v36  ;;  %v954_v52 = vpop.permute.xlu1 %953 }
 0x5df   :  { %v2216_v37 = vpop.eup %2215 }
 0x5e0   :  { %v701_v38 = vsel %vm198_vm3, %v2216_v37, 0.0 }
 0x5e1   :  { %702 = vadd.xlane.f32.xlu0 %v701_v38 }
 0x5f7   :  { %874 = vrot.lane.b32.xlu0 %v2414_v41, %s2279_s18 }
 0x666   :  { %v700_v39 = vpop.xlane.xlu0 %699 }
 0x667   :  { %2217 = vrcp.f32 %v700_v39 }
 0x66a   :  { %v703_v42 = vpop.xlane.xlu0 %702 }
 0x66b   :  { %2219 = vrcp.f32 %v703_v42 }
 0x66e   :  { %v875_v51 = vpop.permute.xlu0 %874 }
 0x674   :  { %v2218_v45 = vpop.eup %2217 }
 0x675   :  { %v706_v46 = vmul.f32 %v2218_v45, %v2214_v34 }
 0x677   :  { %2079 = vmatmul.mubr.msk.f32.vlgmr.msra.gmra.mxu0 %vm198_vm3, %v706_v46 }
 0x678   :  { %v2220_v47 = vpop.eup %2219  ;;  %2087 = vmatpush3.xpose.msk.msra.mxu0 %vm198_vm3, %v877_v43  ;;  %2088 = vmatprep.mubr.msk.f32.mxu0 %vm2272_vm2, %v2271_v35 }
 0x679   :  { %v707_v50 = vmul.f32 %v2220_v47, %v2216_v37  ;;  %2096 = vmatprep.subr.mxu0 %v2271_v35 }
 0x67b   :  { %2084 = vmatmul.mubr.msk.f32.vlgmr.msra.gmra.mxu1 %vm198_vm3, %v707_v50  ;;  %2089 = vmatmul.mubr.msk.f32.vlgmr.msra.gmra.mxu0 %vm198_vm3, %v875_v51 }
 0x67c   :  { %2092 = vmatpush3.xpose.msk.msra.mxu1 %vm198_vm3, %v956_v49  ;;  %2093 = vmatprep.mubr.msk.f32.mxu1 %vm2272_vm2, %v2271_v35 }
 0x67d   :  { %2101 = vmatprep.subr.mxu1 %v2271_v35  ;;  %2098 = vmatprep.mubr.msk.f32.mxu0 %vm2272_vm2, %v2271_v35 }
 0x67f   :  { %2094 = vmatmul.mubr.msk.f32.vlgmr.msra.gmra.mxu1 %vm198_vm3, %v954_v52 }
 0x680   :  { %2103 = vmatprep.mubr.msk.f32.mxu1 %vm2272_vm2, %v2271_v35 }
 0x737   :  { %v2501_v53 = vpop.f32.mrf.mxu0 }
 0x739   :  { %v2080_v54 = vpop.f32.mrf.mxu0 }
 0x73b   :  { %v2503_v55 = vpop.f32.mrf.mxu1  ;;  %v948_v56 = vpop.f32.mrf.mxu0 }
 0x73c   :  { %v949_v57 = vadd.f32 %v948_v56, %v2432_v44 }
 0x73d   :  { %v2085_v58 = vpop.f32.mrf.mxu1  ;;  %v2090_v59 = vpop.f32.mrf.mxu0 }
 0x73e   :  { %v1031_v60 = vsel %vm198_vm3, %v949_v57, -inf }
 0x73f   :  { %1032 = vmax.xlane.f32.xlu0 %v1031_v60  ;;  %v1027_v61 = vpop.f32.mrf.mxu1  ;;  %v1565_v60 = vld [vmem:[%s2672_s6 + $0x10] sm:$0xff] }
 0x740   :  { %v1028_v62 = vadd.f32 %v1027_v61, %v2438_v48  ;;  %v1564_v61 = vld [vmem:[%s2672_s6 + $0x8] sm:$0xff] }
 0x741   :  { %v2095_v63 = vpop.f32.mrf.mxu1 }
 0x742   :  { %v1034_v2 = vsel %vm198_vm3, %v1028_v62, -inf }
 0x743   :  { %1035 = vmax.xlane.f32.xlu1 %v1034_v2 }
 0x754   :  { %1129 = vrot.lane.b32.xlu1 %v2411_v40, %s2280_s19 }
 0x755   :  { %1053 = vrot.lane.b32.xlu0 %v2414_v41, %s2280_s19 }
 0x758   :  { %1221 = vrot.lane.b32.xlu1 %v2414_v41, %s2281_s20 }
 0x75c   :  { %1300 = vrot.lane.b32.xlu1 %v2411_v40, %s2281_s20 }
 0x760   :  { %1298 = vrot.lane.b32.xlu1 %v2411_v40, %s2282_s21 }
 0x7c8   :  { %v1033_v3 = vpop.xlane.xlu0 %1032 }
 0x7c9   :  { %v1037_v4 = vsub.f32 %v949_v57, %v1033_v3 }
 0x7cb   :  { %v1039_v5 = vmul.f32 1.442695, %v1037_v4 }
 0x7cc   :  { %v1054_v6 = vpop.permute.xlu0 %1053  ;;  %v1036_v7 = vpop.xlane.xlu1 %1035 }
 0x7cd   :  { %2221 = vpow2.f32 %v1039_v5  ;;  %v1038_v8 = vsub.f32 %v1028_v62, %v1036_v7  ;;  %2097 = vmatpush3.msra.mxu0 %v1054_v6  ;;  %v1563_v62 = vld [vmem:[%s2672_s6] sm:$0xff] }
 0x7ce   :  { %2106 = vmatprep.subr.mxu0 %v2271_v35 }
 0x7cf   :  { %v1041_v9 = vmul.f32 1.442695, %v1038_v8 }
 0x7d0   :  { %v1130_v10 = vpop.permute.xlu1 %1129 }
 0x7d1   :  { %2223 = vpow2.f32 %v1041_v9  ;;  %2102 = vmatpush3.msra.mxu1 %v1130_v10  ;;  %v1956_v9 = vld [vmem:[%s2673_s7] ss:$0 sm:$0xff] }
 0x7d2   :  { %2111 = vmatprep.subr.mxu1 %v2271_v35 }
 0x7d4   :  { %v1222_v17 = vpop.permute.xlu1 %1221 }
 0x7d8   :  { %v1301_v21 = vpop.permute.xlu1 %1300 }
 0x7da   :  { %v2222_v11 = vpop.eup %2221 }
 0x7db   :  { %v1043_v12 = vsel %vm198_vm3, %v2222_v11, 0.0 }
 0x7dc   :  { %1044 = vadd.xlane.f32.xlu0 %v1043_v12  ;;  %v1299_v24 = vpop.permute.xlu1 %1298 }
 0x7de   :  { %v2224_v13 = vpop.eup %2223 }
 0x7df   :  { %v1046_v14 = vsel %vm198_vm3, %v2224_v13, 0.0 }
 0x7e0   :  { %1047 = vadd.xlane.f32.xlu0 %v1046_v14 }
 0x7f6   :  { %1219 = vrot.lane.b32.xlu0 %v2414_v41, %s2282_s21 }
 0x865   :  { %v1045_v15 = vpop.xlane.xlu0 %1044 }
 0x866   :  { %2225 = vrcp.f32 %v1045_v15 }
 0x869   :  { %v1048_v16 = vpop.xlane.xlu0 %1047 }
 0x86a   :  { %2227 = vrcp.f32 %v1048_v16 }
 0x86d   :  { %v1220_v23 = vpop.permute.xlu0 %1219 }
 0x873   :  { %v2226_v18 = vpop.eup %2225 }
 0x874   :  { %v1051_v19 = vmul.f32 %v2226_v18, %v2222_v11 }
 0x876   :  { %2099 = vmatmul.mubr.msk.f32.vlgmr.msra.gmra.mxu0 %vm198_vm3, %v1051_v19 }
 0x877   :  { %v2228_v20 = vpop.eup %2227  ;;  %2107 = vmatpush3.xpose.msk.msra.mxu0 %vm198_vm3, %v1222_v17  ;;  %2108 = vmatprep.mubr.msk.f32.mxu0 %vm2272_vm2, %v2271_v35 }
 0x878   :  { %v1052_v22 = vmul.f32 %v2228_v20, %v2224_v13  ;;  %2116 = vmatprep.subr.mxu0 %v2271_v35 }
 0x87a   :  { %2104 = vmatmul.mubr.msk.f32.vlgmr.msra.gmra.mxu1 %vm198_vm3, %v1052_v22  ;;  %2109 = vmatmul.mubr.msk.f32.vlgmr.msra.gmra.mxu0 %vm198_vm3, %v1220_v23 }
 0x87b   :  { %2112 = vmatpush3.xpose.msk.msra.mxu1 %vm198_vm3, %v1301_v21  ;;  %2113 = vmatprep.mubr.msk.f32.mxu1 %vm2272_vm2, %v2271_v35 }
 0x87c   :  { %2121 = vmatprep.subr.mxu1 %v2271_v35  ;;  %2118 = vmatprep.mubr.msk.f32.mxu0 %vm2272_vm2, %v2271_v35 }
 0x87e   :  { %2114 = vmatmul.mubr.msk.f32.vlgmr.msra.gmra.mxu1 %vm198_vm3, %v1299_v24 }
 0x87f   :  { %2123 = vmatprep.mubr.msk.f32.mxu1 %vm2272_vm2, %v2271_v35 }
 0x936   :  { %v1125_v25 = vpop.f32.mrf.mxu0 }
 0x938   :  { %v2100_v26 = vpop.f32.mrf.mxu0 }
 0x939   :  { %v1704_v26 = vld [vmem:[%s2676_s10 + $0x18] sm:$0xff] }
 0x93a   :  { %v1201_v27 = vpop.f32.mrf.mxu1  ;;  %v1293_v28 = vpop.f32.mrf.mxu0 }
 0x93b   :  { %v1294_v29 = vadd.f32 %v1293_v28, %v2432_v44  ;;  %v1702_v28 = vld [vmem:[%s2676_s10 + $0x8] sm:$0xff] }
 0x93c   :  { %v2105_v30 = vpop.f32.mrf.mxu1  ;;  %v2110_v31 = vpop.f32.mrf.mxu0 }
 0x93d   :  { %v1376_v32 = vsel %vm198_vm3, %v1294_v29, -inf }
 0x93e   :  { %1377 = vmax.xlane.f32.xlu0 %v1376_v32  ;;  %v1372_v33 = vpop.f32.mrf.mxu1 }
 0x93f   :  { %v1373_v34 = vadd.f32 %v1372_v33, %v2438_v48 }
 0x940   :  { %v2115_v36 = vpop.f32.mrf.mxu1 }
 0x941   :  { %v1379_v37 = vsel %vm198_vm3, %v1373_v34, -inf }
 0x942   :  { %1380 = vmax.xlane.f32.xlu1 %v1379_v37 }
 0x953   :  { %1474 = vrot.lane.b32.xlu1 %v2411_v40, %s2283_s22 }
 0x957   :  { %862 = vrot.lane.b32.xlu1 %v2501_v53, %s2284_s23 }
 0x95b   :  { %864 = vrot.lane.b32.xlu1 %v2503_v55, %s2284_s23 }
 0x95f   :  { %1209 = vrot.lane.b32.xlu1 %v1201_v27, %s2285_s24  ;;  %v1703_v27 = vld [vmem:[%s2676_s10 + $0x10] sm:$0xff] }
 0x9c7   :  { %v1378_v35 = vpop.xlane.xlu0 %1377 }
 0x9c8   :  { %v1382_v44 = vsub.f32 %v1294_v29, %v1378_v35  ;;  %v1701_v29 = vld [vmem:[%s2676_s10] sm:$0xff] }
 0x9c9   :  { %v1959_v35 = vld [vmem:[%s2674_s8] ss:$0 sm:$0xff] }
 0x9ca   :  { %v1384_v48 = vmul.f32 1.442695, %v1382_v44 }
 0x9cb   :  { %v1381_v38 = vpop.xlane.xlu1 %1380 }
 0x9cc   :  { %2229 = vpow2.f32 %v1384_v48  ;;  %v1383_v39 = vsub.f32 %v1373_v34, %v1381_v38  ;;  %v1960_v48 = vld [vmem:[%s2675_s9] ss:$0 sm:$0xff] }
 0x9ce   :  { %v1386_v42 = vmul.f32 1.442695, %v1383_v39 }
 0x9cf   :  { %v1475_v43 = vpop.permute.xlu1 %1474 }
 0x9d0   :  { %2231 = vpow2.f32 %v1386_v42  ;;  %2122 = vmatpush3.msra.mxu1 %v1475_v43 }
 0x9d3   :  { %v863_v40 = vpop.permute.xlu1 %862 }
 0x9d4   :  { %869 = vst.msk [vmem:[#allocation3] sm:$0xff] %vm868_vm4, %v863_v40 }
 0x9d7   :  { %v865_v45 = vpop.permute.xlu1 %864 }
 0x9d8   :  { %870 = vst.msk [vmem:[#allocation3 + $0x8] sm:$0xff] %vm868_vm4, %v865_v45 }
 0x9d9   :  { %v2230_v46 = vpop.eup %2229 }
 0x9da   :  { %v1388_v47 = vsel %vm198_vm3, %v2230_v46, 0.0 }
 0x9db   :  { %1389 = vadd.xlane.f32.xlu0 %v1388_v47  ;;  %v1210_v49 = vpop.permute.xlu1 %1209  ;;  %v1823_v47 = vld [vmem:[%s2678_s12 + $0x70] sm:$0xff] }
 0x9dc   :  { %1215 = vst.msk [vmem:[#allocation3 + $0x8] sm:$0xff] %vm1213_vm5, %v1210_v49  ;;  %v1822_v49 = vld [vmem:[%s2678_s12 + $0x68] sm:$0xff] }
 0x9dd   :  { %v2232_v50 = vpop.eup %2231 }
 0x9de   :  { %v1391_v51 = vsel %vm198_vm3, %v2232_v50, 0.0 }
 0x9df   :  { %1392 = vadd.xlane.f32.xlu0 %v1391_v51  ;;  %v1820_v51 = vld [vmem:[%s2678_s12 + $0x58] sm:$0xff] }
 0x9f5   :  { %1398 = vrot.lane.b32.xlu0 %v2414_v41, %s2283_s22  ;;  %v1566_v41 = vld [vmem:[%s2672_s6 + $0x18] sm:$0xff] }
 0x9f6   :  { %2126 = vmatprep.subr.mxu1 %v1566_v41 }
 0x9f9   :  { %1207 = vrot.lane.b32.xlu0 %v1125_v25, %s2285_s24 }
 0xa64   :  { %v1390_v52 = vpop.xlane.xlu0 %1389 }
 0xa65   :  { %2233 = vrcp.f32 %v1390_v52  ;;  %v1819_v52 = vld [vmem:[%s2678_s12 + $0x50] sm:$0xff] }
 0xa68   :  { %v1393_v53 = vpop.xlane.xlu0 %1392 }
 0xa69   :  { %2235 = vrcp.f32 %v1393_v53  ;;  %v1818_v53 = vld [vmem:[%s2678_s12 + $0x48] sm:$0xff] }
 0xa6c   :  { %v1399_v54 = vpop.permute.xlu0 %1398 }
 0xa6d   :  { %2117 = vmatpush3.msra.mxu0 %v1399_v54  ;;  %v1817_v54 = vld [vmem:[%s2678_s12 + $0x40] sm:$0xff] }
 0xa70   :  { %v1208_v55 = vpop.permute.xlu0 %1207 }
 0xa71   :  { %1214 = vst.msk [vmem:[#allocation3] sm:$0xff] %vm1213_vm5, %v1208_v55  ;;  %v1816_v55 = vld [vmem:[%s2678_s12 + $0x38] sm:$0xff] }
 0xa72   :  { %v2234_v56 = vpop.eup %2233 }
 0xa73   :  { %v1396_v57 = vmul.f32 %v2234_v56, %v2230_v46  ;;  %v1824_v46 = vld [vmem:[%s2678_s12 + $0x78] sm:$0xff]  ;;  %v1815_v56 = vld [vmem:[%s2678_s12 + $0x30] sm:$0xff] }
 0xa74   :  { %2148 = vmatprep.subr.mxu0 %v1824_v46 }
 0xa75   :  { %2119 = vmatmul.mubr.msk.f32.vlgmr.msra.gmra.mxu0 %vm198_vm3, %v1396_v57  ;;  %v1814_v57 = vld [vmem:[%s2678_s12 + $0x28] sm:$0xff] }
 0xa76   :  { %v2236_v58 = vpop.eup %2235  ;;  %2149 = vmatpush3.msra.mxu0 %v1824_v46 }
 0xa77   :  { %v1397_v59 = vmul.f32 %v2236_v58, %v2232_v50  ;;  %2150 = vmatprep.subr.mxu0 %v1823_v47  ;;  %v1821_v50 = vld [vmem:[%s2678_s12 + $0x60] sm:$0xff] }
 0xa78   :  { %2151 = vmatpush3.msra.mxu0 %v1823_v47  ;;  %v1813_v58 = vld [vmem:[%s2678_s12 + $0x20] sm:$0xff] }
 0xa79   :  { %2124 = vmatmul.mubr.msk.f32.vlgmr.msra.gmra.mxu1 %vm198_vm3, %v1397_v59  ;;  %2152 = vmatprep.subr.mxu0 %v1822_v49  ;;  %v1812_v59 = vld [vmem:[%s2678_s12 + $0x18] sm:$0xff] }
 0xa7a   :  { %2127 = vmatpush3.msra.mxu1 %v1566_v41  ;;  %2153 = vmatpush3.msra.mxu0 %v1822_v49  ;;  %v1811_v41 = vld [vmem:[%s2678_s12 + $0x10] sm:$0xff] }
 0xa7b   :  { %2128 = vmatprep.subr.mxu1 %v1565_v60  ;;  %2154 = vmatprep.subr.mxu0 %v1821_v50 }
 0xa7c   :  { %2129 = vmatpush3.msra.mxu1 %v1565_v60  ;;  %2155 = vmatpush3.msra.mxu0 %v1821_v50  ;;  %v1810_v60 = vld [vmem:[%s2678_s12 + $0x8] sm:$0xff] }
 0xa7d   :  { %2130 = vmatprep.subr.mxu1 %v1564_v61  ;;  %2156 = vmatprep.subr.mxu0 %v1820_v51 }
 0xa7e   :  { %2131 = vmatpush3.msra.mxu1 %v1564_v61  ;;  %2157 = vmatpush3.msra.mxu0 %v1820_v51  ;;  %v1809_v61 = vld [vmem:[%s2678_s12] sm:$0xff] }
 0xa7f   :  { %2132 = vmatprep.subr.mxu1 %v1563_v62  ;;  %2158 = vmatprep.subr.mxu0 %v1819_v52 }
 0xa80   :  { %2133 = vmatpush3.msra.mxu1 %v1563_v62  ;;  %2159 = vmatpush3.msra.mxu0 %v1819_v52  ;;  %v1961_v62 = vld [vmem:[%s2677_s11] ss:$0 sm:$0xff] }
 0xa81   :  { %2137 = vmatprep.subr.mxu1 %v1704_v26  ;;  %2160 = vmatprep.subr.mxu0 %v1818_v53 }
 0xa82   :  { %2161 = vmatpush3.msra.mxu0 %v1818_v53 }
 0xa83   :  { %2162 = vmatprep.subr.mxu0 %v1817_v54 }
 0xa84   :  { %2163 = vmatpush3.msra.mxu0 %v1817_v54 }
 0xa85   :  { %2164 = vmatprep.subr.mxu0 %v1816_v55 }
 0xa86   :  { %2165 = vmatpush3.msra.mxu0 %v1816_v55 }
 0xa87   :  { %2166 = vmatprep.subr.mxu0 %v1815_v56 }
 0xa88   :  { %2167 = vmatpush3.msra.mxu0 %v1815_v56 }
 0xa89   :  { %2168 = vmatprep.subr.mxu0 %v1814_v57 }
 0xa8a   :  { %2169 = vmatpush3.msra.mxu0 %v1814_v57 }
 0xa8b   :  { %2170 = vmatprep.subr.mxu0 %v1813_v58 }
 0xa8c   :  { %2171 = vmatpush3.msra.mxu0 %v1813_v58 }
 0xa8d   :  { %2172 = vmatprep.subr.mxu0 %v1812_v59 }
 0xa8e   :  { %2173 = vmatpush3.msra.mxu0 %v1812_v59 }
 0xa8f   :  { %2174 = vmatprep.subr.mxu0 %v1811_v41 }
 0xa90   :  { %2175 = vmatpush3.msra.mxu0 %v1811_v41 }
 0xa91   :  { %2176 = vmatprep.subr.mxu0 %v1810_v60 }
 0xa92   :  { %2177 = vmatpush3.msra.mxu0 %v1810_v60 }
 0xa93   :  { %2178 = vmatprep.subr.mxu0 %v1809_v61 }
 0xa94   :  { %2179 = vmatpush3.msra.mxu0 %v1809_v61 }
 0xb35   :  { %v1470_v63 = vpop.f32.mrf.mxu0 }
 0xb36   :  { %1552 = vrot.lane.b32.xlu0 %v1470_v63, %s2286_s29 }
 0xb37   :  { %v2120_v2 = vpop.f32.mrf.mxu0 }
 0xb39   :  { %v1546_v3 = vpop.f32.mrf.mxu1 }
 0xb3a   :  { %1554 = vrot.lane.b32.xlu1 %v1546_v3, %s2286_s29 }
 0xb3b   :  { %v2125_v4 = vpop.f32.mrf.mxu1 }
 0xba8   :  { %v1553_v5 = vpop.permute.xlu0 %1552 }
 0xba9   :  { %1559 = vst.msk [vmem:[#allocation3] sm:$0xff] %vm1558_vm6, %v1553_v5 }
 0xbac   :  { %v1555_v6 = vpop.permute.xlu1 %1554 }
 0xbad   :  { %1560 = vst.msk [vmem:[#allocation3 + $0x8] sm:$0xff] %vm1558_vm6, %v1555_v6 }
 0xbb0   :  { %v1561_v7 = vld [vmem:[#allocation3] sm:$0xff] }
 0xbb1   :  { %2134 = vmatprep.mubr.msk.f32.mxu1 %vm52_vm0, %v1561_v7 }
 0xbb4   :  { %v1562_v8 = vld [vmem:[#allocation3 + $0x8] sm:$0xff] }
 0xbb5   :  { %2135 = vmatmul.mubr.msk.f32.vlgmr.msra.gmra.mxu1 %vm52_vm0, %v1562_v8 }
 0xbb6   :  { %2138 = vmatpush3.msra.mxu1 %v1704_v26 }
 0xbb7   :  { %2139 = vmatprep.subr.mxu1 %v1703_v27 }
 0xbb8   :  { %2140 = vmatpush3.msra.mxu1 %v1703_v27 }
 0xbb9   :  { %2141 = vmatprep.subr.mxu1 %v1702_v28 }
 0xbba   :  { %2142 = vmatpush3.msra.mxu1 %v1702_v28 }
 0xbbb   :  { %2143 = vmatprep.subr.mxu1 %v1701_v29 }
 0xbbc   :  { %2144 = vmatpush3.msra.mxu1 %v1701_v29 }
 0xc75   :  { %v2136_v10 = vpop.f32.mrf.mxu1 }
 0xc76   :  { %v1652_v11 = vadd.f32 %v2136_v10, %v1956_v9 }
 0xc77   :  { %v1646_v12 = vpop.f32.mrf.mxu1 }
 0xc78   :  { %v2571_v13 = vadd.f32 %v1652_v11, %v2372_v1  ;;  %v1647_v14 = vadd.f32 %v1956_v9, %v1646_v12 }
 0xc7a   :  { %v2574_v15 = vadd.f32 %v1647_v14, %v2367_v0  ;;  %v1660_v16 = vsel %vm52_vm0, %v2571_v13, 0.0 }
 0xc7b   :  { %1661 = vadd.xlane.f32.xlu1 %v1660_v16 }
 0xc7c   :  { %v1657_v17 = vsel %vm52_vm0, %v2574_v15, 0.0 }
 0xc7d   :  { %1658 = vadd.xlane.f32.xlu0 %v1657_v17 }
 0xd04   :  { %v1662_v18 = vpop.xlane.xlu1 %1661 }
 0xd05   :  { %v1664_v19 = vmul.f32 0.03125, %v1662_v18 }
 0xd06   :  { %v1659_v20 = vpop.xlane.xlu0 %1658 }
 0xd07   :  { %v1663_v21 = vmul.f32 0.03125, %v1659_v20  ;;  %v1666_v22 = vsub.f32 %v2571_v13, %v1664_v19  ;;  %v1966_v19 = vld [vmem:[%s2679_s13] ss:$0 sm:$0xff] }
 0xd09   :  { %v1665_v1 = vsub.f32 %v2574_v15, %v1663_v21  ;;  %v1668_v24 = vmul.f32 %v1666_v22, %v1666_v22 }
 0xd0b   :  { %v1667_v23 = vmul.f32 %v1665_v1, %v1665_v1  ;;  %v1672_v25 = vsel %vm52_vm0, %v1668_v24, 0.0 }
 0xd0d   :  { %v1669_v0 = vsel %vm52_vm0, %v1667_v23, 0.0 }
 0xd0e   :  { %1670 = vadd.xlane.f32.xlu0 %v1669_v0 }
 0xd12   :  { %1673 = vadd.xlane.f32.xlu0 %v1672_v25 }
 0xd97   :  { %v1671_v30 = vpop.xlane.xlu0 %1670 }
 0xd98   :  { %v1675_v31 = vmul.f32 0.03125, %v1671_v30 }
 0xd9a   :  { %v1677_v32 = vadd.f32 1e-05, %v1675_v31 }
 0xd9b   :  { %v1674_v33 = vpop.xlane.xlu0 %1673 }
 0xd9c   :  { %2237 = vrsqrt.f32 %v1677_v32  ;;  %v1676_v34 = vmul.f32 0.03125, %v1674_v33 }
 0xd9e   :  { %v1678_v36 = vadd.f32 1e-05, %v1676_v34 }
 0xda0   :  { %2239 = vrsqrt.f32 %v1678_v36 }
 0xda9   :  { %v2238_v37 = vpop.eup %2237 }
 0xdaa   :  { %v1681_v44 = vmul.f32 %v2238_v37, %v1665_v1 }
 0xdac   :  { %v1690_v38 = vmul.f32 %v1959_v35, %v1681_v44 }
 0xdad   :  { %v2240_v39 = vpop.eup %2239 }
 0xdae   :  { %v1682_v42 = vmul.f32 %v2240_v39, %v1666_v22  ;;  %v1699_v43 = vadd.f32 %v1960_v48, %v1690_v38 }
 0xdb0   :  { %v1691_v40 = vmul.f32 %v1959_v35, %v1682_v42  ;;  %2145 = vmatprep.mubr.msk.f32.mxu1 %vm52_vm0, %v1699_v43 }
 0xdb2   :  { %v1700_v45 = vadd.f32 %v1960_v48, %v1691_v40 }
 0xdb4   :  { %2146 = vmatmul.mubr.msk.f32.vlgmr.msra.gmra.mxu1 %vm52_vm0, %v1700_v45 }
 0xe74   :  { %v2147_v63 = vpop.f32.mrf.mxu1 }
 0xe75   :  { %v1790_v2 = vadd.f32 %v2147_v63, %v1961_v62 }
 0xe76   :  { %v1784_v3 = vpop.f32.mrf.mxu1 }
 0xe77   :  { %v1965_v4 = vmul.f32 -1.702, %v1790_v2  ;;  %v1785_v5 = vadd.f32 %v1961_v62, %v1784_v3 }
 0xe79   :  { %v1799_v6 = vmul.f32 1.442695, %v1965_v4  ;;  %v1964_v7 = vmul.f32 -1.702, %v1785_v5 }
 0xe7b   :  { %2241 = vpow2.f32 %v1799_v6  ;;  %v1797_v8 = vmul.f32 1.442695, %v1964_v7 }
 0xe7d   :  { %2243 = vpow2.f32 %v1797_v8 }
 0xe88   :  { %v2242_v9 = vpop.eup %2241 }
 0xe89   :  { %v1802_v10 = vadd.f32 1.0, %v2242_v9 }
 0xe8a   :  { %v2244_v11 = vpop.eup %2243 }
 0xe8b   :  { %v1801_v12 = vadd.f32 1.0, %v2244_v11  ;;  %2245 = vrcp.f32 %v1802_v10 }
 0xe8d   :  { %2247 = vrcp.f32 %v1801_v12 }
 0xe98   :  { %v2246_v14 = vpop.eup %2245 }
 0xe99   :  { %v1808_v18 = vmul.f32 %v2246_v14, %v1790_v2 }
 0xe9a   :  { %v2248_v16 = vpop.eup %2247 }
 0xe9b   :  { %v1807_v17 = vmul.f32 %v2248_v16, %v1785_v5 }
 0xe9d   :  { %2180 = vmatprep.mubr.f32.mxu0 %v1807_v17 }
 0xe9e   :  { %2181 = vmatmul.mubr.f32.vlgmr.msra.gmra.mxu0 %v1808_v18 }
 0xf5e   :  { %v2182_v20 = vpop.f32.mrf.mxu0 }
 0xf5f   :  { %v1904_v21 = vadd.f32 %v2182_v20, %v1966_v19 }
 0xf60   :  { %v1898_v22 = vpop.f32.mrf.mxu0 }
 0xf61   :  { %v1908_v1 = vadd.f32 %v1904_v21, %v2571_v13  ;;  %v1899_v23 = vadd.f32 %v1966_v19, %v1898_v22 }
 0xf63   :  { %1910 = vst.msk [vmem:[#allocation4 + $0x8] sm:$0xff] %vm52_vm0, %v1908_v1  ;;  %v1907_v0 = vadd.f32 %v1899_v23, %v2574_v15 }
 0xf65   :  { %1909 = vst.msk [vmem:[#allocation4] sm:$0xff] %vm52_vm0, %v1907_v0 }
 0xf66   :  { %2260 = shalt.err (!%p2257_p4)
}
 0xf67   :  { %s2288_s13 = smov 128  }
 0xf68   :  { %1922 = dma.vmem_to_hbm [thread:$0]  %s1917_s3, 256, %s2680_s14, [#allocation5], %s2288_s13, %s2288_s13, %s2284_s23  }
 0xf69   :  { %2269 = dma.done.wait [#allocation5], 256  }
 0xf6a   :  { %2270 = vsyncadd [#allocation5], 4294967040 }
 0xf6b   :  { %1926 = vsyncpa [#allocation5], 1 }

</bundles_post_ra>
